<compile_context>
chip_gen: v6e
topology: v6e:2x2x1
jax: 0.10.0
libtpu: 0.0.40
codegen_flags: <defaults>
</compile_context>

<pallas_src>
import functools
import math

import jax
import jax.numpy as jnp
from jax.experimental import pallas as pl
from jax.experimental.pallas import tpu as pltpu


# ----------------------------------------------------------------------------
# DYAN real dictionary (plain JAX, tiny)
# ----------------------------------------------------------------------------
def creat_real_dictionary(T, rr, theta):
    """Standard DyanOF dictionary: (T, 4*N + 1), column-normalized."""
    i = jnp.arange(T, dtype=jnp.float32)[:, None]            # (T, 1)
    rr = rr[None, :].astype(jnp.float32)                     # (1, N)
    theta = theta[None, :].astype(jnp.float32)                # (1, N)
    pow_r = rr ** i                                           # r^i
    sgn = jnp.where(jnp.mod(i, 2.0) == 0.0, 1.0, -1.0)        # (-1)^i -> (-r)^i
    c = jnp.cos(i * theta)
    s = jnp.sin(i * theta)
    W1 = pow_r * c
    W2 = sgn * pow_r * c
    W3 = pow_r * s
    W4 = sgn * pow_r * s
    ones = jnp.ones((T, 1), jnp.float32)
    dic = jnp.concatenate([ones, W1, W2, W3, W4], axis=1)     # (T, 4N+1)
    G = jnp.sqrt(jnp.sum(dic * dic, axis=0))
    G = jnp.where(G == 0.0, jnp.sqrt(jnp.float32(T)), G)
    return dic / G


def _fista_matrix(A, max_iter):
    """P(A): x_final = P(A) @ c for the (identity-shrink) affine FISTA loop.

    Mirrors the PyTorch recursion with x_old = X@c, y_old = Y@c, X_0 = Y_0 = 0.
    Momentum scalars are data-independent Python constants.
    """
    K = A.shape[0]
    eye = jnp.eye(K, dtype=jnp.float32)
    X_old = jnp.zeros((K, K), jnp.float32)
    Y = jnp.zeros((K, K), jnp.float32)
    t = 1.0
    for _ in range(max_iter):
        X_new = jnp.dot(A, Y, preferred_element_type=jnp.float32) + eye
        t_new = (1.0 + math.sqrt(1.0 + 4.0 * t * t)) / 2.0
        tt = (t - 1.0) / t_new
        Y = X_new * (1.0 + tt) - X_old * tt
        X_old = X_new
        t = t_new
    return X_old                                              # (K, K)


# ----------------------------------------------------------------------------
# Pallas kernel: out_tile = W @ x_tile + bias   (lane-dense, bytes-bound)
# ----------------------------------------------------------------------------
def _sc2_kernel(w_ref, b_ref, x_ref, o_ref):
    o_ref[...] = (
        jnp.dot(w_ref[...], x_ref[...], preferred_element_type=jnp.float32)
        + b_ref[...]                                          # (T2,1) lane-broadcast
    )


def _pick_p_tile(P):
    """Lane-tile width over the point dimension.

    Multiples of 128 give unmasked lane-dense stores; cap at 512 (anything
    larger buys nothing — the kernel is HBM-bytes bound and tiles are tiny).
    If P is not a multiple of 128, fall back to a full-extent block.
    """
    if P % 128 == 0:
        for cand in (512, 384, 256, 128):
            if P % cand == 0:
                return cand
    return P


@functools.partial(jax.jit,
                   static_argnames=("T", "PRE", "gamma", "max_iter", "p_tile"))
def sc2_forward(x, rr, theta, T, PRE, gamma=0.05, max_iter=40, p_tile=None):
    """Pallas implementation of SC2.forward(x); x is (B, T, P) float32."""
    B, T_in, P = x.shape
    assert T_in == T
    x = x.astype(jnp.float32)
    T2 = T + PRE

    # --- host-side (tiny) precompute: collapse the affine FISTA recursion ----
    dic = creat_real_dictionary(T, rr, theta)                 # (T,  K)
    dic2 = creat_real_dictionary(T2, rr, theta)               # (T2, K)
    K = dic.shape[1]

    DtD = jnp.dot(dic.T, dic, preferred_element_type=jnp.float32)   # (K, K)
    # torch.norm(DtD, p=2) with no dim == Frobenius norm of the flattened tensor
    L = jnp.sqrt(jnp.sum(DtD * DtD))
    linv = jnp.where(L == 0.0, 0.0, 1.0 / L)
    A = jnp.eye(K, dtype=jnp.float32) - DtD * linv            # (K, K)

    M = _fista_matrix(A, max_iter)                            # x_40 = M @ c
    dic2M = jnp.dot(dic2, M, preferred_element_type=jnp.float32)       # (T2, K)
    W = jnp.dot(dic2M, dic.T, preferred_element_type=jnp.float32) * linv  # (T2, T)
    bias = (-(jnp.float32(gamma) * linv)
            * jnp.sum(dic2M, axis=1, keepdims=True))          # (T2, 1)

    # --- Pallas call: tile the original (B, T, P) layout directly ------------
    Pt = p_tile if p_tile is not None else _pick_p_tile(P)
    grid = (B, P // Pt)

    flops = 2 * T2 * T * B * P + T2 * B * P
    bytes_accessed = 4 * (B * T * P + B * T2 * P + T2 * T + T2)

    out = pl.pallas_call(
        _sc2_kernel,
        out_shape=jax.ShapeDtypeStruct((B, T2, P), jnp.float32),
        grid_spec=pltpu.PrefetchScalarGridSpec(
            num_scalar_prefetch=0,
            grid=grid,
            in_specs=[
                pl.BlockSpec((T2, T), lambda b, p: (0, 0)),          # W (resident)
                pl.BlockSpec((T2, 1), lambda b, p: (0, 0)),          # bias
                pl.BlockSpec((None, T, Pt), lambda b, p: (b, 0, p)),  # x tile
            ],
            out_specs=pl.BlockSpec((None, T2, Pt), lambda b, p: (b, 0, p)),
        ),
        compiler_params=pltpu.CompilerParams(
            dimension_semantics=("parallel", "parallel")),
        cost_estimate=pl.CostEstimate(flops=flops, transcendentals=0,
                                      bytes_accessed=bytes_accessed),
    )(W, bias, x)
    return out                                                # (B, T+PRE, P)


# ----------------------------------------------------------------------------
# Pure-JAX reference (mirror of the PyTorch code) for the correctness check
# ----------------------------------------------------------------------------
def sc2_reference(x, rr, theta, T, PRE, gamma=0.05, max_iter=40):
    x = x.astype(jnp.float32)
    dic = creat_real_dictionary(T, rr, theta)
    dic2 = creat_real_dictionary(T + PRE, rr, theta)
    K = dic.shape[1]
    DtD = dic.T @ dic
    L = jnp.sqrt(jnp.sum(DtD * DtD))
    linv = jnp.where(L == 0.0, 0.0, 1.0 / L)
    A = jnp.eye(K, dtype=jnp.float32) - DtD * linv
    DtY = jnp.matmul(dic.T, x) * linv                         # (B, K, P)
    lambd = gamma * linv
    B, _, P = x.shape
    x_old = jnp.zeros((B, K, P), jnp.float32)
    y_old = x_old
    t = 1.0
    for _ in range(max_iter):
        Ay = jnp.matmul(A, y_old)
        x_new = Ay + DtY - lambd
        x_new = jnp.sign(x_new) * jnp.maximum(jnp.abs(x_new),
                                              jnp.zeros_like(x_new))
        t_new = (1.0 + math.sqrt(1.0 + 4.0 * t ** 2)) / 2.0
        tt = (t - 1.0) / t_new
        y_old = x_new * (1.0 + tt) - x_old * tt
        t = t_new
        x_old = x_new
    return jnp.matmul(dic2, x_old)                            # (B, T+PRE, P)


if __name__ == "__main__":
    # Small deterministic setup: N=8 poles -> K = 4*8+1 = 33, T=8, PRE=2
    N_POLES = 8
    T = 8
    PRE = 2
    B = 2
    P = 128

    key = jax.random.PRNGKey(0)
    k_rr, k_th, k_x = jax.random.split(key, 3)
    rr = jax.random.uniform(k_rr, (N_POLES,), jnp.float32, 0.8, 1.0)
    theta = jax.random.uniform(k_th, (N_POLES,), jnp.float32, 0.1, 1.5)
    # (self.gamma parameter exists in the module but is unused in forward.)
    x = jax.random.normal(k_x, (B, T, P), jnp.float32)

    out = jax.block_until_ready(sc2_forward(x, rr, theta, T=T, PRE=PRE))
    ref = jax.block_until_ready(sc2_reference(x, rr, theta, T, PRE))

    assert out.shape == (B, T + PRE, P)
    denom = jnp.maximum(jnp.max(jnp.abs(ref)), 1e-6)
    rel_err = float(jnp.max(jnp.abs(out - ref)) / denom)
    assert rel_err < 1e-2, f"relative error too large: {rel_err}"
    print("KERNEL_OK")
</pallas_src>

<mosaic_0001>
module attributes {stable_mosaic.version = 11 : i64} {
  func.func @_sc2_kernel(%arg0: i32, %arg1: i32, %arg2: memref<10x8xf32, #tpu.memory_space<vmem>>, %arg3: memref<10x1xf32, #tpu.memory_space<vmem>>, %arg4: memref<1x8x128xf32, #tpu.memory_space<vmem>>, %arg5: memref<1x10x128xf32, #tpu.memory_space<vmem>>) attributes {dimension_semantics = [#tpu.dimension_semantics<parallel>, #tpu.dimension_semantics<parallel>], iteration_bounds = array<i64: 2, 1>, scalar_prefetch = 0 : i64, scratch_operands = 0 : i64, tpu.core_type = #tpu.core_type<tc>, window_params = [{pipeline_mode = #tpu.pipeline_mode<synchronous>, transform_indices = @transform_0, window_bounds = array<i64: 10, 8>}, {pipeline_mode = #tpu.pipeline_mode<synchronous>, transform_indices = @transform_1, window_bounds = array<i64: 10, 1>}, {transform_indices = @transform_2, window_bounds = array<i64: 1, 8, 128>}, {transform_indices = @transform_3, window_bounds = array<i64: 1, 10, 128>}]} {
    %c0 = arith.constant 0 : index
    %c0_0 = arith.constant 0 : index
    %0 = vector.load %arg2[%c0, %c0_0] : memref<10x8xf32, #tpu.memory_space<vmem>>, vector<10x8xf32>
    %c0_1 = arith.constant 0 : index
    %c0_2 = arith.constant 0 : index
    %c0_3 = arith.constant 0 : index
    %1 = vector.load %arg4[%c0_1, %c0_2, %c0_3] : memref<1x8x128xf32, #tpu.memory_space<vmem>>, vector<1x8x128xf32>
    %2 = vector.shape_cast %1 : vector<1x8x128xf32> to vector<8x128xf32>
    %cst = arith.constant dense<0.000000e+00> : vector<10x128xf32>
    %3 = tpu.matmul %0, %2, %cst {dimension_numbers = #tpu.dot_dimension_numbers<[1], [0], [0], [1], [0, 0, 1, 1], [], []>} : vector<10x8xf32>, vector<8x128xf32>, vector<10x128xf32> -> vector<10x128xf32>
    %c0_4 = arith.constant 0 : index
    %c0_5 = arith.constant 0 : index
    %4 = vector.load %arg3[%c0_4, %c0_5] : memref<10x1xf32, #tpu.memory_space<vmem>>, vector<10x1xf32>
    %5 = vector.broadcast %4 : vector<10x1xf32> to vector<10x128xf32>
    %6 = arith.addf %3, %5 : vector<10x128xf32>
    %c0_6 = arith.constant 0 : index
    %c0_7 = arith.constant 0 : index
    %c0_8 = arith.constant 0 : index
    %7 = vector.load %arg5[%c0_6, %c0_7, %c0_8] : memref<1x10x128xf32, #tpu.memory_space<vmem>>, vector<1x10x128xf32>
    %8 = vector.shape_cast %7 : vector<1x10x128xf32> to vector<10x128xf32>
    %9 = vector.shape_cast %6 : vector<10x128xf32> to vector<1x10x128xf32>
    tpu.vector_store %arg5[%c0_6, %c0_7, %c0_8], %9 {strides = array<i32>} : memref<1x10x128xf32, #tpu.memory_space<vmem>>, vector<1x10x128xf32>,
    return
  }
  func.func @transform_0(%arg0: i32, %arg1: i32) -> (i32, i32) {
    %c0_i32 = arith.constant 0 : i32
    %c0_i32_0 = arith.constant 0 : i32
    %c0_i32_1 = arith.constant 0 : i32
    return %c0_i32, %c0_i32_0 : i32, i32
  }
  func.func @transform_1(%arg0: i32, %arg1: i32) -> (i32, i32) {
    %c0_i32 = arith.constant 0 : i32
    %c0_i32_0 = arith.constant 0 : i32
    %c0_i32_1 = arith.constant 0 : i32
    return %c0_i32, %c0_i32_0 : i32, i32
  }
  func.func @transform_2(%arg0: i32, %arg1: i32) -> (i32, i32, i32) {
    %c0_i32 = arith.constant 0 : i32
    %c0_i32_0 = arith.constant 0 : i32
    return %arg0, %c0_i32, %arg1 : i32, i32, i32
  }
  func.func @transform_3(%arg0: i32, %arg1: i32) -> (i32, i32, i32) {
    %c0_i32 = arith.constant 0 : i32
    %c0_i32_0 = arith.constant 0 : i32
    return %arg0, %c0_i32, %arg1 : i32, i32, i32
  }
}

</mosaic_0001>

<bundles_post_ra>
// kernel: sc2_forward.1
= control target key start
LH: loop header
LB: loop body
LE: loop exit
PB: predicated region body
PF: predicated region fallthrough
CT: control target
= control target key end

     0   :  { %s470_s12 = smov 0   ;;  %s472_s13 = smov 0   ;;  %s515_s0 = inlined_call_operand.vmem [shape: f32[10,8], index: 0, kind: input, shape index: {}]   ;;  %s516_s1 = inlined_call_operand.vmem [shape: f32[10,1], index: 1, kind: input, shape index: {}]   ;;  %s517_s2 = inlined_call_operand.vmem [shape: f32[2,8,128], index: 2, kind: input, shape index: {}]   ;;  %s518_s3 = inlined_call_operand.vmem [shape: f32[2,10,128], index: 3, kind: output, shape index: {}]  }
   0x1   :  { %s474_s14 = smov 0  }
   0x2 LB: > { %s25_s15 = sadd.s32 1, %s443_s13  ;;  %p382_p0 = scmp.ge.s32.totalorder %s447_s14, 1  ;;  %s447_s14 = sphi %s474_s14, %s13_s14   ;;  %s443_s13 = sphi %s472_s13, %s520_s13   ;;  %s439_s12 = sphi %s470_s12, %s519_s12  }
   0x3   : > { %p27_p1 = scmp.ge.s32.totalorder %s25_s15, 2  ;;  %p155_p2 = scmp.lt.s32.totalorder %s447_s14, 3 }
   0x5   : > { %s522_s15 = smov (%p27_p1, %s25_s15), 0  ;;  %p156_p3 = pnand %p382_p0, %p155_p2 }
   0x6   : > { %p184_p4 = scmp.lt.s32.totalorder (!%p156_p3), %s439_s12, 1 }
   0x7   : > { %159 = sbr.rel (%p156_p3) target bundleno = 216 (0xd8), region = 32 }
   0xc   : > { %v199_v0 = vld [vmem:[%s515_s0] sm:$0xff]  ;;  %vm214_vm0 = vcmask 64512   ;;  %v449_v1 = vmov 0   ;;  %s524_s12 = smov (!%p184_p4, %s439_s12), 1  ;;  %v203_v3 = vld [vmem:[%s516_s1 + $0x8] sm:$0x3] }
   0xd   : > { %396 = vmatprep.mubr.msk.f32.mxu0 %vm214_vm0, %v199_v0  ;;  %424 = vset.pattern.permute.xlu0 %v449_v1  ;;  %v202_v2 = vld [vmem:[%s516_s1] sm:$0xff]  ;;  %s383_s22 = sshll.u32 %s524_s12, 3  ;;  %v200_v5 = vld [vmem:[%s515_s0 + $0x8] sm:$0x3]  ;;  %s390_s28 = sshll.u32 %s524_s12, 4 }
   0xe   : > { %206 = vperm.xlu0 %424, %v202_v2   ;;  %s190_s25 = scalar_lea.vmem %s517_s2, %s383_s22  ;;  %s198_s4 = scalar_lea.vmem %s518_s3, %s390_s28 }
   0xf   : > { %v201_v4 = vld [vmem:[%s190_s25] sm:$0xff] }
  0x10   : > { %394 = vmatprep.subr.mxu0 %v201_v4 }
  0x11   : > { %395 = vmatpush3.msra.mxu0 %v201_v4 }
  0x12   : > { %211 = vperm.xlu0 %424, %v203_v3   ;;  %397 = vmatmul.mubr.msk.f32.vlgmr.msra.gmra.mxu0 %vm214_vm0, %v200_v5 }
  0x89   : > { %v207_v6 = vpop.permute.xlu0 %206 }
  0x8d   : > { %v212_v7 = vpop.permute.xlu0 %211 }
  0xd2   : > { %v398_v8 = vpop.f32.mrf.mxu0 }
  0xd3   : > { %v293_v9 = vadd.f32 %v398_v8, %v212_v7 }
  0xd4   : > { %v287_v10 = vpop.f32.mrf.mxu0 }
  0xd5   : > { %297 = vst [vmem:[%s198_s4 + $0x8] sm:$0x3] %v293_v9  ;;  %v288_v11 = vadd.f32 %v287_v10, %v207_v6 }
  0xd7   : > { %296 = vst [vmem:[%s198_s4] sm:$0xff] %v288_v11 }
  0xd8 PF: > { %s13_s14 = sadd.s32 1, %s447_s14   ;;  %s519_s12 = smov %s443_s13 }
  0xd9   : > { %p10_p5 = scmp.ge.s32.totalorder %s13_s14, 4   ;;  %s520_s13 = smov %s522_s15 }
  0xdb   :  { %12 = sbr.rel (!%p10_p5) target bundleno = 2 (0x2), region = 62 }

</bundles_post_ra>
